<compile_context>
chip_gen: v7x
topology: tpu7x:2x2x1
jax: 0.10.0
libtpu: 0.0.40
codegen_flags: <defaults>
</compile_context>

<pallas_src>
import jax
import jax.numpy as jnp
from jax.experimental import pallas as pl
from jax.experimental.pallas import tpu as pltpu


def _round_up(n: int, m: int) -> int:
    return ((n + m - 1) // m) * m


def _make_mlp_kernel(n_layers: int):
    """Fused MLP kernel body for a fixed number of Linear layers."""

    def kernel(*refs):
        # refs = (x_ref, w1_ref, b1_ref, ..., wN_ref, bN_ref, o_ref)
        x_ref = refs[0]
        o_ref = refs[-1]
        h = x_ref[...]                                   # (tb, F), f32 or bf16
        for l in range(n_layers):
            w = refs[1 + 2 * l][...]
            b = refs[2 + 2 * l][...]
            h = jnp.dot(h, w, preferred_element_type=jnp.float32) + b
            if l < n_layers - 1:
                h = jnp.maximum(h, 0.0)                  # ReLU between hidden layers
        o_ref[...] = h.astype(o_ref.dtype)

    return kernel


def _choose_batch_tile(B: int, max_batch_tile: int) -> int:
    """Pick a batch tile that is a multiple of 8 and gives a balanced grid."""
    if B <= max_batch_tile:
        return _round_up(B, 8)
    n_steps = -(-B // max_batch_tile)
    if n_steps % 2:
        n_steps += 1                 # even grid -> balanced across v7x's 2 TCs
    return _round_up(-(-B // n_steps), 8)


def fully_connected_forward(x, params, *, max_batch_tile=4096,
                            min_pallas_batch=512, force_kernel=False):
    """Fused MLP forward.

    x      : (..., in_features) float32 or bfloat16 (bf16 is used as-is; the
             matmuls accumulate in f32)
    params : list of (W, b) with W of shape (in, out), b of shape (1, out)
    """
    orig_shape = x.shape
    in_features = orig_shape[-1]
    x2 = x.reshape(-1, in_features)
    B = x2.shape[0]
    n_layers = len(params)
    out_dim = params[-1][0].shape[1]

    if B < min_pallas_batch and not force_kernel:
        # Tiny batch: fixed pallas_call/grid overhead dominates; let XLA fuse it.
        h = x2
        for l, (w, b) in enumerate(params):
            h = jnp.dot(h, w, preferred_element_type=jnp.float32) + b
            if l < n_layers - 1:
                h = jnp.maximum(h, 0.0)
        y = h.astype(x.dtype)
    else:
        tb = _choose_batch_tile(B, max_batch_tile)
        grid = (pl.cdiv(B, tb),)     # ragged last block handled by Pallas

        in_specs = [pl.BlockSpec((tb, in_features), lambda i: (i, 0))]
        flat_args = [x2]
        for (w, b) in params:
            # Constant index maps -> weights/biases stay VMEM-resident across
            # all batch steps (no re-DMA).
            in_specs.append(pl.BlockSpec(w.shape, lambda i: (0, 0)))
            in_specs.append(pl.BlockSpec(b.shape, lambda i: (0, 0)))
            flat_args.append(w)
            flat_args.append(b)

        out_shape = jax.ShapeDtypeStruct((B, out_dim), x.dtype)
        out_spec = pl.BlockSpec((tb, out_dim), lambda i: (i, 0))

        y = pl.pallas_call(
            _make_mlp_kernel(n_layers),
            out_shape=out_shape,
            grid=grid,
            in_specs=in_specs,
            out_specs=out_spec,
            compiler_params=pltpu.CompilerParams(
                dimension_semantics=("parallel",)),
        )(*flat_args)

    y = y.reshape(orig_shape[:-1] + (out_dim,))
    # torch.squeeze(...) on the net output (host-side glue).
    return jnp.squeeze(y)


def init_params(layer_size_list, key):
    """Deterministic parameter init matching nn.Linear shapes.

    layer_size_list = [in0, h1, ..., out]; produces len-1 Linear layers.
    Weights are returned as (in, out) for the kernel (PyTorch stores (out, in)).
    """
    params = []
    for l in range(len(layer_size_list) - 1):
        fan_in = layer_size_list[l]
        fan_out = layer_size_list[l + 1]
        key, kw, kb = jax.random.split(key, 3)
        bound = 1.0 / (fan_in ** 0.5)
        w = jax.random.uniform(kw, (fan_in, fan_out), jnp.float32, -bound, bound)
        b = jax.random.uniform(kb, (1, fan_out), jnp.float32, -bound, bound)
        params.append((w, b))
    return params


def reference_forward(x, params):
    """Pure-JAX reference of the same MLP (for sanity checking)."""
    h = x
    for l, (w, b) in enumerate(params):
        h = h @ w + b
        if l < len(params) - 1:
            h = jnp.maximum(h, 0.0)
    return jnp.squeeze(h)


if __name__ == "__main__":
    # Module hyper-params (small, consistent with the PyTorch module):
    nChannel = 4
    numSampleInput = 16
    in_features = nChannel * numSampleInput          # 64
    layerSizeList = [in_features, 32, 1]             # MLP: 64 -> 32 -> 1

    key = jax.random.PRNGKey(0)
    key, kp = jax.random.split(key)
    params = init_params(layerSizeList, kp)

    # 1) Small single-window batch, kernel path forced (single grid step).
    key, kx = jax.random.split(key)
    x_small = jax.random.normal(kx, (8, in_features), jnp.float32)
    y_small = jax.block_until_ready(
        fully_connected_forward(x_small, params, force_kernel=True))
    y_small_ref = jax.block_until_ready(reference_forward(x_small, params))
    assert y_small.shape == y_small_ref.shape == (8,), (y_small.shape, y_small_ref.shape)
    assert jnp.allclose(y_small, y_small_ref, rtol=1e-5, atol=1e-5)

    # Same small batch through the auto-dispatch (pure-JAX tiny-batch path).
    y_small_auto = jax.block_until_ready(fully_connected_forward(x_small, params))
    assert jnp.allclose(y_small_auto, y_small_ref, rtol=1e-5, atol=1e-5)

    # 2) Batch of windows with B not a multiple of the tile: exercises grid > 1,
    #    the even-step balanced tiling, and the ragged last block (unpadded x,
    #    out-of-bounds output rows dropped at writeback).
    key, kx2 = jax.random.split(key)
    x_big = jax.random.normal(kx2, (600, in_features), jnp.float32)
    y_big = jax.block_until_ready(
        fully_connected_forward(x_big, params, max_batch_tile=256))
    y_big_ref = jax.block_until_ready(reference_forward(x_big, params))
    assert y_big.shape == y_big_ref.shape == (600,), (y_big.shape, y_big_ref.shape)
    assert jnp.allclose(y_big, y_big_ref, rtol=1e-5, atol=1e-5)

    # 3) B not a multiple of 8, forced kernel: ragged block within one step.
    key, kx3 = jax.random.split(key)
    x_odd = jax.random.normal(kx3, (13, in_features), jnp.float32)
    y_odd = jax.block_until_ready(
        fully_connected_forward(x_odd, params, force_kernel=True))
    y_odd_ref = jax.block_until_ready(reference_forward(x_odd, params))
    assert y_odd.shape == y_odd_ref.shape == (13,), (y_odd.shape, y_odd_ref.shape)
    assert jnp.allclose(y_odd, y_odd_ref, rtol=1e-5, atol=1e-5)

    print("KERNEL_OK")
</pallas_src>

<mosaic_0001>
module attributes {stable_mosaic.version = 11 : i64} {
  func.func @kernel(%arg0: i32, %arg1: memref<8x64xf32, #tpu.memory_space<vmem>>, %arg2: memref<64x32xf32, #tpu.memory_space<vmem>>, %arg3: memref<1x32xf32, #tpu.memory_space<vmem>>, %arg4: memref<32x1xf32, #tpu.memory_space<vmem>>, %arg5: memref<1x1xf32, #tpu.memory_space<vmem>>, %arg6: memref<8x1xf32, #tpu.memory_space<vmem>>) attributes {dimension_semantics = [#tpu.dimension_semantics<parallel>], iteration_bounds = array<i64: 1>, scalar_prefetch = 0 : i64, scratch_operands = 0 : i64, tpu.core_type = #tpu.core_type<tc>, window_params = [{transform_indices = @transform_0, window_bounds = array<i64: 8, 64>}, {pipeline_mode = #tpu.pipeline_mode<synchronous>, transform_indices = @transform_1, window_bounds = array<i64: 64, 32>}, {pipeline_mode = #tpu.pipeline_mode<synchronous>, transform_indices = @transform_2, window_bounds = array<i64: 1, 32>}, {pipeline_mode = #tpu.pipeline_mode<synchronous>, transform_indices = @transform_3, window_bounds = array<i64: 32, 1>}, {pipeline_mode = #tpu.pipeline_mode<synchronous>, transform_indices = @transform_4, window_bounds = array<i64: 1, 1>}, {transform_indices = @transform_5, window_bounds = array<i64: 8, 1>}]} {
    %c0 = arith.constant 0 : index
    %c0_0 = arith.constant 0 : index
    %0 = vector.load %arg1[%c0, %c0_0] : memref<8x64xf32, #tpu.memory_space<vmem>>, vector<8x64xf32>
    %c0_1 = arith.constant 0 : index
    %c0_2 = arith.constant 0 : index
    %1 = vector.load %arg2[%c0_1, %c0_2] : memref<64x32xf32, #tpu.memory_space<vmem>>, vector<64x32xf32>
    %c0_3 = arith.constant 0 : index
    %c0_4 = arith.constant 0 : index
    %2 = vector.load %arg3[%c0_3, %c0_4] : memref<1x32xf32, #tpu.memory_space<vmem>>, vector<1x32xf32>
    %cst = arith.constant dense<0.000000e+00> : vector<8x32xf32>
    %3 = tpu.matmul %0, %1, %cst {dimension_numbers = #tpu.dot_dimension_numbers<[1], [0], [0], [1], [0, 0, 1, 1], [], []>} : vector<8x64xf32>, vector<64x32xf32>, vector<8x32xf32> -> vector<8x32xf32>
    %4 = vector.broadcast %2 : vector<1x32xf32> to vector<8x32xf32>
    %5 = arith.addf %3, %4 : vector<8x32xf32>
    %cst_5 = arith.constant 0.000000e+00 : f32
    %6 = vector.broadcast %cst_5 : f32 to vector<8x32xf32>
    %7 = arith.maximumf %5, %6 : vector<8x32xf32>
    %c0_6 = arith.constant 0 : index
    %c0_7 = arith.constant 0 : index
    %8 = vector.load %arg4[%c0_6, %c0_7] : memref<32x1xf32, #tpu.memory_space<vmem>>, vector<32x1xf32>
    %c0_8 = arith.constant 0 : index
    %c0_9 = arith.constant 0 : index
    %9 = vector.load %arg5[%c0_8, %c0_9] : memref<1x1xf32, #tpu.memory_space<vmem>>, vector<1x1xf32>
    %cst_10 = arith.constant dense<0.000000e+00> : vector<8x1xf32>
    %10 = tpu.matmul %7, %8, %cst_10 {dimension_numbers = #tpu.dot_dimension_numbers<[1], [0], [0], [1], [0, 0, 1, 1], [], []>} : vector<8x32xf32>, vector<32x1xf32>, vector<8x1xf32> -> vector<8x1xf32>
    %11 = vector.broadcast %9 : vector<1x1xf32> to vector<8x1xf32>
    %12 = arith.addf %10, %11 : vector<8x1xf32>
    %c0_11 = arith.constant 0 : index
    %c0_12 = arith.constant 0 : index
    %13 = vector.load %arg6[%c0_11, %c0_12] : memref<8x1xf32, #tpu.memory_space<vmem>>, vector<8x1xf32>
    tpu.vector_store %arg6[%c0_11, %c0_12], %12 {strides = array<i32>} : memref<8x1xf32, #tpu.memory_space<vmem>>, vector<8x1xf32>,
    return
  }
  func.func @transform_0(%arg0: i32) -> (i32, i32) {
    %c0_i32 = arith.constant 0 : i32
    %c0_i32_0 = arith.constant 0 : i32
    return %arg0, %c0_i32 : i32, i32
  }
  func.func @transform_1(%arg0: i32) -> (i32, i32) {
    %c0_i32 = arith.constant 0 : i32
    %c0_i32_0 = arith.constant 0 : i32
    %c0_i32_1 = arith.constant 0 : i32
    return %c0_i32, %c0_i32_0 : i32, i32
  }
  func.func @transform_2(%arg0: i32) -> (i32, i32) {
    %c0_i32 = arith.constant 0 : i32
    %c0_i32_0 = arith.constant 0 : i32
    %c0_i32_1 = arith.constant 0 : i32
    return %c0_i32, %c0_i32_0 : i32, i32
  }
  func.func @transform_3(%arg0: i32) -> (i32, i32) {
    %c0_i32 = arith.constant 0 : i32
    %c0_i32_0 = arith.constant 0 : i32
    %c0_i32_1 = arith.constant 0 : i32
    return %c0_i32, %c0_i32_0 : i32, i32
  }
  func.func @transform_4(%arg0: i32) -> (i32, i32) {
    %c0_i32 = arith.constant 0 : i32
    %c0_i32_0 = arith.constant 0 : i32
    %c0_i32_1 = arith.constant 0 : i32
    return %c0_i32, %c0_i32_0 : i32, i32
  }
  func.func @transform_5(%arg0: i32) -> (i32, i32) {
    %c0_i32 = arith.constant 0 : i32
    %c0_i32_0 = arith.constant 0 : i32
    return %arg0, %c0_i32 : i32, i32
  }
}

</mosaic_0001>

<bundles_post_ra>
// kernel: tpu_custom_call.1
= control target key start
LH: loop header
LB: loop body
LE: loop exit
PB: predicated region body
PF: predicated region fallthrough
CT: control target
= control target key end

     0   :  { %v273_v0 = vmov 0.0|0.0   ;;  %vm274_vm0 = vmmov 0   ;;  %v275_v4 = vmov 0.0   ;;  %vm38_vm1 = vcmask 523264   ;;  %s354_s1 = inlined_call_operand.vmem [shape: f32[64,32], index: 1, kind: input, shape index: {}]   ;;  %s355_s3 = inlined_call_operand.vmem [shape: f32[32,1], index: 3, kind: input, shape index: {}]   ;;  %s356_s0 = inlined_call_operand.vmem [shape: f32[8,64], index: 0, kind: input, shape index: {}]   ;;  %s357_s4 = inlined_call_operand.<no memory space> [shape: f32[1,1], index: 4, kind: input, shape index: {}]   ;;  %s358_s2 = inlined_call_operand.vmem [shape: f32[1,32], index: 2, kind: input, shape index: {}]   ;;  %s359_s5 = inlined_call_operand.vmem [shape: f32[8,1], index: 5, kind: output, shape index: {}]  }
   0x1   :  { %252 = vmatprep.subr.bf16.mxu0 %v273_v0  ;;  %v23_v1 = vld [vmem:[%s354_s1] sm:$0xff]  ;;  %v24_v2 = vld [vmem:[%s354_s1 + $0x8] sm:$0xff]  ;;  %v25_v3 = vld [vmem:[%s354_s1 + $0x10] sm:$0xff]  ;;  %238 = vmatprep.mubr.msk.f32.mxu0 %vm274_vm0, %v275_v4  ;;  %v10_v21 = vstv %s357_s4  ;;  %vm124_vm2 = vcmask 261120   ;;  %vm198_vm3 = vcmask 7168  }
   0x2   :  { %v253_v5 = vpack.c.bf16 %v24_v2, %v23_v1  ;;  %v26_v6 = vld [vmem:[%s354_s1 + $0x18] sm:$0xff]  ;;  %264 = vmatprep.subr.bf16.mxu1 %v273_v0  ;;  %249 = vmatprep.mubr.msk.f32.mxu1 %vm274_vm0, %v275_v4  ;;  %v113_v8 = vld [vmem:[%s355_s3] sm:$0xff]  ;;  %v114_v9 = vld [vmem:[%s355_s3 + $0x8] sm:$0xff]  ;;  %11 = vst [vmem:[#allocation2] sm:$0x1] %v10_v21 }
   0x3   :  { %v256_v7 = vpack.c.bf16 %v26_v6, %v25_v3  ;;  %v27_v10 = vld [vmem:[%s354_s1 + $0x20] sm:$0xff]  ;;  %v28_v11 = vld [vmem:[%s354_s1 + $0x28] sm:$0xff]  ;;  %v265_v12 = vpack.c.bf16 %v114_v9, %v113_v8  ;;  %v29_v14 = vld [vmem:[%s354_s1 + $0x30] sm:$0xff] }
   0x4   :  { %254 = vmatpush3.bf16.msra.mxu0 %v253_v5  ;;  %v259_v13 = vpack.c.bf16 %v28_v11, %v27_v10  ;;  %v30_v15 = vld [vmem:[%s354_s1 + $0x38] sm:$0xff]  ;;  %v22_v17 = vld [vmem:[%s356_s0] sm:$0xff]  ;;  %v115_v18 = vld [vmem:[%s355_s3 + $0x10] sm:$0xff] }
   0x5   :  { %255 = vmatprep.subr.bf16.mxu0 %v273_v0  ;;  %266 = vmatpush3.bf16.msra.mxu1 %v265_v12  ;;  %v262_v16 = vpack.c.bf16 %v30_v15, %v29_v14  ;;  %v116_v19 = vld [vmem:[%s355_s3 + $0x18] sm:$0xff]  ;;  %v204_v22 = vld [vmem:[%s358_s2] ss:$0 sm:$0xff] }
   0x6   :  { %267 = vmatprep.subr.bf16.mxu1 %v273_v0  ;;  %v268_v20 = vpack.c.bf16 %v116_v19, %v115_v18 }
   0x8   :  { %257 = vmatpush3.bf16.msra.mxu0 %v256_v7 }
   0x9   :  { %258 = vmatprep.subr.bf16.mxu0 %v273_v0  ;;  %269 = vmatpush3.bf16.msra.mxu1 %v268_v20  ;;  %v206_v27 = vld [vmem:[#allocation2] ss:$0 sm:$0xff] }
   0xc   :  { %260 = vmatpush3.bf16.msra.mxu0 %v259_v13 }
   0xd   :  { %261 = vmatprep.subr.bf16.mxu0 %v273_v0 }
  0x10   :  { %263 = vmatpush3.bf16.msra.mxu0 %v262_v16 }
  0x13   :  { %239 = vmatmul.mubr.msk.f32.vlgmr.msra.gmra.mrb[0].mxu0 %vm38_vm1, %v22_v17 }
  0xe6   :  { %v108_v23 = vpop.f32.mrb[0].mxu0 }
  0xe7   :  { %v109_v24 = vadd.f32 %v204_v22, %v108_v23  ;;  %v240_v25 = vpop.f32.mrb[1].mxu0 }
  0xe9   :  { %v112_v26 = vmax.f32 %v109_v24, 0.0 }
  0xeb   :  { %250 = vmatmul.mubr.msk.f32.vlgmr.msra.gmra.mrb[0].mxu1 %vm124_vm2, %v112_v26 }
 0x1be   :  { %v194_v28 = vpop.f32.mrb[0].mxu1 }
 0x1bf   :  { %v195_v29 = vadd.f32 %v206_v27, %v194_v28  ;;  %v251_v30 = vpop.f32.mrb[1].mxu1 }
 0x1c1   :  { %199 = vst.msk [vmem:[%s359_s5] sm:$0xff] %vm198_vm3, %v195_v29 }

</bundles_post_ra>
